<compile_context>
chip_gen: v7x
topology: tpu7x:2x2x1
jax: 0.10.0
libtpu: 0.0.40
codegen_flags: <defaults>
</compile_context>

<pallas_src>
import math

import jax
import jax.numpy as jnp
from jax.experimental import pallas as pl
from jax.experimental.pallas import tpu as pltpu


def _gelu_tanh(x):
    # Matches the PyTorch GELU module exactly:
    # 0.5 * x * (1 + tanh(sqrt(2/pi) * (x + 0.044715 * x^3)))
    c = math.sqrt(2.0 / math.pi)
    return 0.5 * x * (1.0 + jnp.tanh(c * (x + 0.044715 * (x * x * x))))


def ffn_kernel(x_ref, w1_ref, b1_ref, w2_ref, b2_ref, o_ref, acc_ref):
    # x_ref:   (tm, d_model)      token tile (resident across k)
    # w1_ref:  (d_model, tk_ff)   W1 column chunk
    # b1_ref:  (1, tk_ff)         bias chunk
    # w2_ref:  (tk_ff, d_model)   W2 row chunk
    # b2_ref:  (1, d_model)       output bias (used only in finalize)
    # o_ref:   (tm, d_model)      output tile (same block across k)
    # acc_ref: (tm, d_model) f32  VMEM accumulator
    k = pl.program_id(1)

    @pl.when(k == 0)
    def _():
        acc_ref[...] = jnp.zeros_like(acc_ref)

    # First matmul: native-dtype operands, f32 accumulation on the MXU.
    h = jnp.dot(x_ref[...], w1_ref[...], preferred_element_type=jnp.float32)
    h = h + b1_ref[...].astype(jnp.float32)          # (1, tk_ff) broadcast

    # GELU in f32 (EUP tanh), then cast to the W2 dtype so the second
    # matmul's LHS is narrow (bf16 when weights are bf16).
    g = _gelu_tanh(h).astype(w2_ref.dtype)

    acc_ref[...] += jnp.dot(g, w2_ref[...], preferred_element_type=jnp.float32)

    @pl.when(k == pl.num_programs(1) - 1)
    def _():
        out = acc_ref[...] + b2_ref[...].astype(jnp.float32)
        o_ref[...] = out.astype(o_ref.dtype)


def _hw_defaults():
    """Per-generation tile / VMEM defaults (conservative fallback if query fails)."""
    vmem_cap = None
    try:
        vmem_cap = int(pltpu.get_tpu_info().vmem_capacity_bytes)
    except Exception:
        vmem_cap = None
    if vmem_cap is None:
        vmem_cap = 64 * 1024 * 1024  # conservative: v7x per-TC budget is safe everywhere
    if vmem_cap <= 96 * 1024 * 1024:
        # v7x-class: 64 MiB per TensorCore, 2 TCs/chip.  Leave ~12% headroom
        # for compiler-internal scratch (the f32 GELU intermediate etc.).
        return dict(tm=512, tk_ff=512, num_cores=2, vmem_limit=(vmem_cap * 7) // 8)
    # v5e / v6e: 128 MiB VMEM, single TensorCore -> use ~100 MiB.
    return dict(tm=1024, tk_ff=1024, num_cores=1,
                vmem_limit=min(100 * 1024 * 1024, (vmem_cap * 7) // 8))


def _pick_tile(total, cap, aligns):
    """Largest t <= cap dividing `total`, preferring MXU/lane-aligned sizes."""
    cap = min(cap, total)
    if cap == total:
        return total                      # full-extent block is always legal
    for align in aligns:
        for t in range(cap, 0, -1):
            if total % t == 0 and t % align == 0:
                return t
    return total                          # last resort: full extent


def _vmem_bytes(tm, tk, d_model, in_b, w_b, out_b):
    db = 2  # Pallas double-buffers pipelined inputs/outputs
    return (tm * d_model * in_b * db              # x tile
            + d_model * tk * w_b * db             # W1 chunk
            + tk * d_model * w_b * db             # W2 chunk
            + (tk + d_model) * w_b * db           # biases
            + tm * d_model * out_b * db           # output tile
            + tm * d_model * 4                    # f32 accumulator scratch
            + 2 * tm * tk * 4)                    # f32 h / g intermediates


def positionwise_feed_forward(x, w1, b1, w2, b2, *, tm=None, tk_ff=None,
                              compute_dtype=None):
    """x: [B, S, d_model]; w1: [d_model, d_ff]; b1: [d_ff];
    w2: [d_ff, d_model]; b2: [d_model].

    compute_dtype: if set (e.g. jnp.bfloat16), x/W1/W2 are cast to it before
    the kernel (MXU operands narrow, f32 accumulation); output keeps x's
    original dtype.
    """
    B, S, d_model = x.shape
    d_ff = w1.shape[1]
    M = B * S
    out_dtype = x.dtype

    if compute_dtype is not None:
        x = x.astype(compute_dtype)
        w1 = w1.astype(compute_dtype)
        w2 = w2.astype(compute_dtype)
        # biases stay in their dtype; they are added in f32 inside the kernel.

    hw = _hw_defaults()
    tm_req = hw["tm"] if tm is None else tm
    tk_req = hw["tk_ff"] if tk_ff is None else tk_ff

    # Pick tiles: divisors of M / d_ff, MXU-256-aligned when possible.
    tm = _pick_tile(M, tm_req, aligns=(256, 128, 8))
    tk_ff = _pick_tile(d_ff, tk_req, aligns=(256, 128))

    # On 2-TC parts (v7x) make sure the token axis has >= 2 tiles so the
    # "parallel" axis can shard across TensorCores.
    if hw["num_cores"] >= 2 and M // tm < hw["num_cores"]:
        tm_split = _pick_tile(M, max(M // hw["num_cores"], 8), aligns=(256, 128, 8))
        if M // tm_split >= hw["num_cores"]:
            tm = tm_split

    # Shrink tiles until the estimated VMEM footprint fits the budget.
    in_b = jnp.dtype(x.dtype).itemsize
    w_b = jnp.dtype(w1.dtype).itemsize
    out_b = jnp.dtype(out_dtype).itemsize
    budget = hw["vmem_limit"]
    while _vmem_bytes(tm, tk_ff, d_model, in_b, w_b, out_b) > budget:
        if tk_ff > 256 and (tk_ff // 2) % 128 == 0:      # shrink tk_ff first:
            tk_ff //= 2                                   # intensity scales with tm
        elif tm > 256 and (tm // 2) % 8 == 0:
            tm //= 2
        else:
            break

    assert M % tm == 0, "token count must be divisible by the row tile"
    assert d_ff % tk_ff == 0, "d_ff must be divisible by the d_ff tile"

    x2d = x.reshape(M, d_model)
    b1_2d = b1.reshape(1, d_ff)
    b2_2d = b2.reshape(1, d_model)

    # Cost estimate: weights are re-streamed once per row tile.
    n_row_tiles = M // tm
    b_bytes = jnp.dtype(b1.dtype).itemsize
    cost = pl.CostEstimate(
        flops=2 * M * d_model * d_ff * 2,                 # two matmuls
        transcendentals=M * d_ff,                          # tanh in GELU
        bytes_accessed=(x2d.size * in_b
                        + M * d_model * out_b
                        + n_row_tiles * (w1.size + w2.size) * w_b
                        + n_row_tiles * (b1.size + b2.size) * b_bytes),
    )

    out2d = pl.pallas_call(
        ffn_kernel,
        out_shape=jax.ShapeDtypeStruct((M, d_model), out_dtype),
        grid_spec=pltpu.PrefetchScalarGridSpec(
            num_scalar_prefetch=0,
            grid=(M // tm, d_ff // tk_ff),
            in_specs=[
                pl.BlockSpec((tm, d_model), lambda i, k: (i, 0)),     # x tile
                pl.BlockSpec((d_model, tk_ff), lambda i, k: (0, k)),  # W1 chunk
                pl.BlockSpec((1, tk_ff), lambda i, k: (0, k)),        # b1 chunk
                pl.BlockSpec((tk_ff, d_model), lambda i, k: (k, 0)),  # W2 chunk
                pl.BlockSpec((1, d_model), lambda i, k: (0, 0)),      # b2
                # NOTE: on v5e, if xprof still shows exposed DMA at k-step
                # boundaries after raising tm, add pipeline_mode=pl.Buffered(3)
                # to the W1/W2 specs (do NOT on v7x: VMEM headroom).
            ],
            out_specs=pl.BlockSpec((tm, d_model), lambda i, k: (i, 0)),
            scratch_shapes=[pltpu.VMEM((tm, d_model), jnp.float32)],  # f32 acc
        ),
        compiler_params=pltpu.CompilerParams(
            dimension_semantics=("parallel", "arbitrary"),
            vmem_limit_bytes=int(hw["vmem_limit"]),
        ),
        cost_estimate=cost,
    )(x2d, w1, b1_2d, w2, b2_2d)

    return out2d.reshape(B, S, d_model)


def _reference(x, w1, b1, w2, b2):
    h = jnp.einsum("bsd,df->bsf", x.astype(jnp.float32),
                   w1.astype(jnp.float32)) + b1.astype(jnp.float32)
    g = _gelu_tanh(h)
    out = jnp.einsum("bsf,fd->bsd", g, w2.astype(jnp.float32)) + b2.astype(jnp.float32)
    return out.astype(x.dtype)


if __name__ == "__main__":
    # Small but lane-aligned shapes: batch=2, seq=8, d_model=128, d_ff=256.
    B, S, d_model, d_ff = 2, 8, 128, 256

    key = jax.random.PRNGKey(0)
    kx, k1, k2, k3, k4 = jax.random.split(key, 5)

    x = jax.random.normal(kx, (B, S, d_model), dtype=jnp.float32)

    # Deterministic parameter init (Linear-like fan-in scaling).
    w1 = jax.random.normal(k1, (d_model, d_ff), dtype=jnp.float32) / math.sqrt(d_model)
    b1 = jax.random.normal(k2, (d_ff,), dtype=jnp.float32) * 0.01
    w2 = jax.random.normal(k3, (d_ff, d_model), dtype=jnp.float32) / math.sqrt(d_ff)
    b2 = jax.random.normal(k4, (d_model,), dtype=jnp.float32) * 0.01

    ref = _reference(x, w1, b1, w2, b2)

    # 1) f32 operand path: bit-for-bit semantics of the module -> tight tolerance.
    out = positionwise_feed_forward(x, w1, b1, w2, b2)
    out = jax.block_until_ready(out)
    assert out.shape == (B, S, d_model)
    assert jnp.allclose(out, ref, atol=1e-4, rtol=1e-4), "f32 path mismatch vs reference"

    # 2) bf16-operand path (MXU-native, halves weight DMA); f32 accumulation.
    #    Looser tolerance since operands are rounded to bf16.
    out_bf16 = positionwise_feed_forward(x, w1, b1, w2, b2,
                                         compute_dtype=jnp.bfloat16)
    out_bf16 = jax.block_until_ready(out_bf16)
    assert out_bf16.dtype == x.dtype
    assert jnp.allclose(out_bf16, ref, atol=5e-2, rtol=5e-2), "bf16 path mismatch vs reference"

    print("KERNEL_OK")
</pallas_src>

<mosaic_0001>
module attributes {stable_mosaic.version = 11 : i64} {
  func.func @ffn_kernel(%arg0: i32, %arg1: i32, %arg2: memref<8x128xf32, #tpu.memory_space<vmem>>, %arg3: memref<128x256xf32, #tpu.memory_space<vmem>>, %arg4: memref<1x256xf32, #tpu.memory_space<vmem>>, %arg5: memref<256x128xf32, #tpu.memory_space<vmem>>, %arg6: memref<1x128xf32, #tpu.memory_space<vmem>>, %arg7: memref<8x128xf32, #tpu.memory_space<vmem>>, %arg8: memref<8x128xf32, #tpu.memory_space<vmem>>) attributes {dimension_semantics = [#tpu.dimension_semantics<parallel>, #tpu.dimension_semantics<arbitrary>], iteration_bounds = array<i64: 2, 1>, scalar_prefetch = 0 : i64, scratch_operands = 1 : i64, tpu.core_type = #tpu.core_type<tc>, window_params = [{transform_indices = @transform_0, window_bounds = array<i64: 8, 128>}, {transform_indices = @transform_1, window_bounds = array<i64: 128, 256>}, {transform_indices = @transform_2, window_bounds = array<i64: 1, 256>}, {transform_indices = @transform_3, window_bounds = array<i64: 256, 128>}, {pipeline_mode = #tpu.pipeline_mode<synchronous>, transform_indices = @transform_4, window_bounds = array<i64: 1, 128>}, {transform_indices = @transform_5, window_bounds = array<i64: 8, 128>}]} {
    %c0_i32 = arith.constant 0 : i32
    %0 = arith.cmpi eq, %arg1, %c0_i32 : i32
    %1 = arith.extui %0 : i1 to i32
    %c0_i32_0 = arith.constant 0 : i32
    %2 = arith.cmpi ne, %1, %c0_i32_0 : i32
    scf.if %2 {
      %cst_19 = arith.constant 0.000000e+00 : f32
      %30 = vector.broadcast %cst_19 : f32 to vector<8x128xf32>
      %c0_20 = arith.constant 0 : index
      %c0_21 = arith.constant 0 : index
      %31 = vector.load %arg8[%c0_20, %c0_21] : memref<8x128xf32, #tpu.memory_space<vmem>>, vector<8x128xf32>
      tpu.vector_store %arg8[%c0_20, %c0_21], %30 {strides = array<i32>} : memref<8x128xf32, #tpu.memory_space<vmem>>, vector<8x128xf32>,
    } else {
    }
    %c0 = arith.constant 0 : index
    %c0_1 = arith.constant 0 : index
    %3 = vector.load %arg2[%c0, %c0_1] : memref<8x128xf32, #tpu.memory_space<vmem>>, vector<8x128xf32>
    %c0_2 = arith.constant 0 : index
    %c0_3 = arith.constant 0 : index
    %4 = vector.load %arg3[%c0_2, %c0_3] : memref<128x256xf32, #tpu.memory_space<vmem>>, vector<128x256xf32>
    %cst = arith.constant dense<0.000000e+00> : vector<8x256xf32>
    %5 = tpu.matmul %3, %4, %cst {dimension_numbers = #tpu.dot_dimension_numbers<[1], [0], [0], [1], [0, 0, 1, 1], [], []>} : vector<8x128xf32>, vector<128x256xf32>, vector<8x256xf32> -> vector<8x256xf32>
    %c0_4 = arith.constant 0 : index
    %c0_5 = arith.constant 0 : index
    %6 = vector.load %arg4[%c0_4, %c0_5] : memref<1x256xf32, #tpu.memory_space<vmem>>, vector<1x256xf32>
    %7 = vector.broadcast %6 : vector<1x256xf32> to vector<8x256xf32>
    %8 = arith.addf %5, %7 : vector<8x256xf32>
    %cst_6 = arith.constant 5.000000e-01 : f32
    %9 = vector.broadcast %cst_6 : f32 to vector<8x256xf32>
    %10 = arith.mulf %9, %8 : vector<8x256xf32>
    %11 = arith.mulf %8, %8 : vector<8x256xf32>
    %12 = arith.mulf %11, %8 : vector<8x256xf32>
    %cst_7 = arith.constant 4.471500e-02 : f32
    %13 = vector.broadcast %cst_7 : f32 to vector<8x256xf32>
    %14 = arith.mulf %13, %12 : vector<8x256xf32>
    %15 = arith.addf %8, %14 : vector<8x256xf32>
    %cst_8 = arith.constant 0.797884583 : f32
    %16 = vector.broadcast %cst_8 : f32 to vector<8x256xf32>
    %17 = arith.mulf %16, %15 : vector<8x256xf32>
    %18 = math.tanh %17 : vector<8x256xf32>
    %cst_9 = arith.constant 1.000000e+00 : f32
    %19 = vector.broadcast %cst_9 : f32 to vector<8x256xf32>
    %20 = arith.addf %19, %18 : vector<8x256xf32>
    %21 = arith.mulf %10, %20 : vector<8x256xf32>
    %c0_10 = arith.constant 0 : index
    %c0_11 = arith.constant 0 : index
    %22 = vector.load %arg8[%c0_10, %c0_11] : memref<8x128xf32, #tpu.memory_space<vmem>>, vector<8x128xf32>
    %c0_12 = arith.constant 0 : index
    %c0_13 = arith.constant 0 : index
    %23 = vector.load %arg5[%c0_12, %c0_13] : memref<256x128xf32, #tpu.memory_space<vmem>>, vector<256x128xf32>
    %cst_14 = arith.constant dense<0.000000e+00> : vector<8x128xf32>
    %24 = tpu.matmul %21, %23, %cst_14 {dimension_numbers = #tpu.dot_dimension_numbers<[1], [0], [0], [1], [0, 0, 1, 1], [], []>} : vector<8x256xf32>, vector<256x128xf32>, vector<8x128xf32> -> vector<8x128xf32>
    %25 = arith.addf %22, %24 : vector<8x128xf32>
    %c0_15 = arith.constant 0 : index
    %c0_16 = arith.constant 0 : index
    %26 = vector.load %arg8[%c0_15, %c0_16] : memref<8x128xf32, #tpu.memory_space<vmem>>, vector<8x128xf32>
    tpu.vector_store %arg8[%c0_15, %c0_16], %25 {strides = array<i32>} : memref<8x128xf32, #tpu.memory_space<vmem>>, vector<8x128xf32>,
    %c0_i32_17 = arith.constant 0 : i32
    %27 = arith.cmpi eq, %arg1, %c0_i32_17 : i32
    %28 = arith.extui %27 : i1 to i32
    %c0_i32_18 = arith.constant 0 : i32
    %29 = arith.cmpi ne, %28, %c0_i32_18 : i32
    scf.if %29 {
      %c0_19 = arith.constant 0 : index
      %c0_20 = arith.constant 0 : index
      %30 = vector.load %arg8[%c0_19, %c0_20] : memref<8x128xf32, #tpu.memory_space<vmem>>, vector<8x128xf32>
      %c0_21 = arith.constant 0 : index
      %c0_22 = arith.constant 0 : index
      %31 = vector.load %arg6[%c0_21, %c0_22] : memref<1x128xf32, #tpu.memory_space<vmem>>, vector<1x128xf32>
      %32 = vector.broadcast %31 : vector<1x128xf32> to vector<8x128xf32>
      %33 = arith.addf %30, %32 : vector<8x128xf32>
      %c0_23 = arith.constant 0 : index
      %c0_24 = arith.constant 0 : index
      %34 = vector.load %arg7[%c0_23, %c0_24] : memref<8x128xf32, #tpu.memory_space<vmem>>, vector<8x128xf32>
      tpu.vector_store %arg7[%c0_23, %c0_24], %33 {strides = array<i32>} : memref<8x128xf32, #tpu.memory_space<vmem>>, vector<8x128xf32>,
    } else {
    }
    return
  }
  func.func @transform_0(%arg0: i32, %arg1: i32) -> (i32, i32) {
    %c0_i32 = arith.constant 0 : i32
    %c0_i32_0 = arith.constant 0 : i32
    return %arg0, %c0_i32 : i32, i32
  }
  func.func @transform_1(%arg0: i32, %arg1: i32) -> (i32, i32) {
    %c0_i32 = arith.constant 0 : i32
    %c0_i32_0 = arith.constant 0 : i32
    return %c0_i32, %arg1 : i32, i32
  }
  func.func @transform_2(%arg0: i32, %arg1: i32) -> (i32, i32) {
    %c0_i32 = arith.constant 0 : i32
    %c0_i32_0 = arith.constant 0 : i32
    return %c0_i32, %arg1 : i32, i32
  }
  func.func @transform_3(%arg0: i32, %arg1: i32) -> (i32, i32) {
    %c0_i32 = arith.constant 0 : i32
    %c0_i32_0 = arith.constant 0 : i32
    return %arg1, %c0_i32 : i32, i32
  }
  func.func @transform_4(%arg0: i32, %arg1: i32) -> (i32, i32) {
    %c0_i32 = arith.constant 0 : i32
    %c0_i32_0 = arith.constant 0 : i32
    %c0_i32_1 = arith.constant 0 : i32
    return %c0_i32, %c0_i32_0 : i32, i32
  }
  func.func @transform_5(%arg0: i32, %arg1: i32) -> (i32, i32) {
    %c0_i32 = arith.constant 0 : i32
    %c0_i32_0 = arith.constant 0 : i32
    return %arg0, %c0_i32 : i32, i32
  }
}

</mosaic_0001>

<bundles_post_ra>
// kernel: tpu_custom_call.1
= control target key start
LH: loop header
LB: loop body
LE: loop exit
PB: predicated region body
PF: predicated region fallthrough
CT: control target
= control target key end

     0   :  { %10 = vsyncpa [#allocation4], 0  ;;  %s1388_s0 = inlined_call_operand.hbm [shape: f32[16,128], index: 0, kind: input, shape index: {}]   ;;  %s1389_s1 = inlined_call_operand.hbm [shape: f32[128,256], index: 1, kind: input, shape index: {}]   ;;  %s1390_s2 = inlined_call_operand.vmem [shape: f32[1,256], index: 2, kind: input, shape index: {}]   ;;  %s1391_s3 = inlined_call_operand.hbm [shape: f32[256,128], index: 3, kind: input, shape index: {}]   ;;  %s1392_s4 = inlined_call_operand.vmem [shape: f32[1,128], index: 4, kind: input, shape index: {}]   ;;  %s1393_s5 = inlined_call_operand.hbm [shape: f32[16,128], index: 5, kind: output, shape index: {}]  }
   0x1   :  { %12 = vsyncpa [#allocation4 + $0x1], 0 }
   0x2   :  { %13 = vsyncpa [#allocation7], 0 }
   0x3   :  { %14 = vsyncpa [#allocation5], 0 }
   0x4   :  { %16 = vsyncpa [#allocation5 + $0x1], 0  ;;  %s1125_s18 = smov 0   ;;  %s1127_s19 = smov 0  }
   0x5   :  { %s1129_s20 = smov 0   ;;  %s1131_s21 = smov 0  }
   0x6   :  { %s1133_s22 = smov 0   ;;  %s1135_s23 = smov 0  }
   0x7 LB: > { %s702_s24 = sadd.s32 4294967295, %s1084_s23   ;;  %s703_s25 = sadd.s32 4294967294, %s1084_s23   ;;  %s1084_s23 = sphi %s1135_s23, %s22_s23   ;;  %s1080_s22 = sphi %s1133_s22, %s1415_s22   ;;  %s1076_s21 = sphi %s1131_s21, %s1414_s21   ;;  %s1072_s20 = sphi %s1129_s20, %s1413_s20   ;;  %s1068_s19 = sphi %s1127_s19, %s1412_s19   ;;  %s1064_s18 = sphi %s1125_s18, %s1411_s18  }
   0x8   : > { %p54_p0 = scmp.ne.s32.totalorder %s1068_s19, %s1064_s18  ;;  %p1159_p1 = scmp.eq.s32.totalorder %s702_s24, 0 }
   0x9   : > { %p1163_p2 = scmp.eq.s32.totalorder %s702_s24, 1  ;;  %p183_p3 = scmp.eq.s32.totalorder %s703_s25, 1 }
   0xa   : > { %s1398_s26 = scalar_select %p1159_p1, 1, 0 }
   0xb   : > { %p1169_p4 = por %p1159_p1, %p54_p0  ;;  %p704_p5 = scmp.ge.s32.totalorder %s1084_s23, 1 }
   0xc   : > { %p1174_p6 = por %p183_p3, %p54_p0  ;;  %p190_p7 = scmp.lt.s32.totalorder %s1084_s23, 3 }
   0xd   : > { %s1400_s28 = scalar_select %p1169_p4, 1, 0 }
   0xe   : > { %s1401_s29 = scalar_select %p1174_p6, 1, 0 }
   0xf   : > { %p1179_p8 = pnand %p704_p5, %p190_p7  ;;  %s1086_s6 = smov [#allocation6]  }
  0x10   : > { %s205_s7 = sshll.u32 %s1086_s6, 4  ;;  %s1087_s9 = smov [#allocation8]   ;;  %s1183_s7 = int_to_ptr.vmem [resolvable:$true] %s205_s7 }
  0x11   : > { %p832_p9 = pneg %p1179_p8  ;;  %s229_s10 = sshll.u32 %s1087_s9, 4  ;;  %s1194_s10 = int_to_ptr.vmem [resolvable:$true] %s229_s10 }
  0x12   : > { %s912_s13 = scalar_lea.hbm %s1389_s1, 4096 }
  0x13   : > { %p1190_p11 = pnand %p832_p9, %p1159_p1  ;;  %p913_p12 = scmp.ne.s32.totalorder %s1389_s1, %s912_s13 }
  0x14   : > { %p919_p5 = scmp.lt.u32.totalorder %s912_s13, %s1389_s1 }
  0x15   : > { %p914_p13 = pneg %p1190_p11 }
  0x17   : > { %p915_p0 = pnand %p914_p13, %p913_p12 }
  0x19   : > { %p916_p3 = pneg %p915_p0 }
  0x1b   : > { %p921_p7 = pnand %p919_p5, %p916_p3 }
  0x1d   : > { %924 = shalt.err (!%p921_p7)
}
  0x1e   : > { %s925_s24 = scalar_lea.vmem %s1183_s7, 4096  ;;  %p933_p1 = scmp.lt.s32.totalorder %s1183_s7, %s1183_s7 }
  0x1f   : > { %p926_p9 = scmp.ne.s32.totalorder %s1183_s7, %s925_s24  ;;  %p934_p12 = scmp.lt.s32.totalorder %s925_s24, %s925_s24 }
  0x21   : > { %p928_p10 = pnand %p926_p9, %p914_p13  ;;  %p935_p0 = por %p934_p12, %p933_p1 }
  0x23   : > { %p929_p6 = pneg %p928_p10 }
  0x25   : > { %p936_p4 = pnand %p935_p0, %p929_p6 }
  0x27   : > { %939 = shalt.err (!%p936_p4)
}
  0x28   : > { %s1088_s25 = smov 256   ;;  %s1089_s6 = smov 16  }
  0x29   : > { %835 = dma.hbm_to_vmem [thread:$0]  (!%p1190_p11), %s1389_s1, 4096, %s1183_s7, [#allocation7], %s1088_s25, %s1088_s25, %s1089_s6  }
  0x2a   : > { %s940_s14 = scalar_lea.hbm %s1391_s3, 4096 }
  0x2b   : > { %p941_p1 = scmp.ne.s32.totalorder %s1391_s3, %s940_s14  ;;  %p947_p10 = scmp.lt.u32.totalorder %s940_s14, %s1391_s3 }
  0x2d   : > { %p943_p4 = pnand %p941_p1, %p914_p13 }
  0x2f   : > { %p944_p6 = pneg %p943_p4 }
  0x31   : > { %p949_p3 = pnand %p947_p10, %p944_p6 }
  0x33   : > { %952 = shalt.err (!%p949_p3)
}
  0x34   : > { %s953_s7 = scalar_lea.vmem %s1194_s10, 4096  ;;  %p961_p12 = scmp.lt.s32.totalorder %s1194_s10, %s1194_s10 }
  0x35   : > { %p954_p5 = scmp.ne.s32.totalorder %s1194_s10, %s953_s7  ;;  %p962_p0 = scmp.lt.s32.totalorder %s953_s7, %s953_s7 }
  0x37   : > { %p956_p7 = pnand %p954_p5, %p914_p13  ;;  %p963_p1 = por %p962_p0, %p961_p12 }
  0x39   : > { %p957_p9 = pneg %p956_p7 }
  0x3b   : > { %p964_p4 = pnand %p963_p1, %p957_p9 }
  0x3d   : > { %967 = shalt.err (!%p964_p4)
}
  0x3e   : > { %s1090_s25 = smov 128   ;;  %s1091_s6 = smov 8  }
  0x3f   : > { %838 = dma.hbm_to_vmem [thread:$0]  (!%p1190_p11), %s1391_s3, 4096, %s1194_s10, [#allocation7], %s1090_s25, %s1090_s25, %s1091_s6  }
  0x40   : > { %s34_s12 = sadd.s32 1, %s1080_s22  ;;  %s41_s13 = sadd.s32 1, %s1072_s20 }
  0x41   : > { %p36_p13 = scmp.ge.s32.totalorder %s34_s12, 2  ;;  %p48_p6 = scmp.ne.s32.totalorder %s1072_s20, %s1068_s19 }
  0x42   : > { %p49_p10 = scmp.eq.s32.totalorder %s1084_s23, 0  ;;  %p849_p3 = scmp.lt.s32.totalorder %s1084_s23, 2 }
  0x43   : > { %s1417_s12 = smov (%p36_p13, %s34_s12), 0  ;;  %p1258_p7 = por %p1163_p2, %p48_p6 }
  0x44   : > { %p50_p5 = por %p49_p10, %p48_p6  ;;  %s38_s8 = ssub.s32 %s1080_s22, %s1417_s12 }
  0x45   : > { %s1404_s14 = scalar_select %p1258_p7, 1, 0 }
  0x46   : > { %s246_s15 = sand.u32 1, %s1072_s20   ;;  %p39_p9 = scmp.eq.s32.totalorder %s38_s8, 0 }
  0x47   : > { %s709_s10 = sshll.u32 %s246_s15, 3  ;;  %s710_s16 = sshll.u32 %s1080_s22, 7 }
  0x48   : > { %s1267_s17 = scalar_select %p39_p9, %s1072_s20, %s41_s13  }
  0x49   : > { %s1272_s25 = scalar_lea.hbm %s1388_s0, %s710_s16  ;;  %s250_s27 = scalar_lea.vmem [#allocation3], %s709_s10 }
  0x4a   : > { %s257_s6 = sshll.u32 %s250_s27, 4  ;;  %p1276_p2 = pnand %p849_p3, %p50_p5  ;;  %s1280_s6 = int_to_ptr.vmem [resolvable:$true] %s257_s6 }
  0x4b   : > { %s247_s11 = scalar_lea.sflag [#allocation4], %s246_s15  ;;  %s968_s13 = scalar_lea.hbm %s1272_s25, 128 }
  0x4c   : > { %p969_p11 = scmp.ne.s32.totalorder %s1272_s25, %s968_s13  ;;  %p970_p12 = pneg %p1276_p2 }
  0x4d   : > { %s973_s16 = scalar_lea.hbm %s1388_s0, 256  ;;  %p974_p4 = scmp.lt.u32.totalorder %s1272_s25, %s1388_s0 }
  0x4e   : > { %p971_p0 = pnand %p970_p12, %p969_p11  ;;  %p975_p13 = scmp.lt.u32.totalorder %s973_s16, %s968_s13 }
  0x4f   : > { %p977_p10 = scmp.lt.u32.totalorder %s968_s13, %s1272_s25 }
  0x50   : > { %p972_p1 = pneg %p971_p0  ;;  %p976_p6 = por %p975_p13, %p974_p4 }
  0x52   : > { %p978_p3 = por %p977_p10, %p976_p6 }
  0x54   : > { %p979_p5 = pnand %p978_p3, %p972_p1 }
  0x56   : > { %982 = shalt.err (!%p979_p5)
}
  0x57   : > { %s983_s15 = scalar_lea.vmem %s1280_s6, 128  ;;  %s1092_s27 = smov [#allocation3]  }
  0x58   : > { %p984_p9 = scmp.ne.s32.totalorder %s1280_s6, %s983_s15  ;;  %s988_s8 = sshll.u32 %s1092_s27, 4  ;;  %s989_s8 = int_to_ptr.vmem [resolvable:$false] %s988_s8 }
  0x59   : > { %s990_s10 = scalar_lea.vmem %s989_s8, 256  ;;  %p991_p7 = scmp.lt.s32.totalorder %s1280_s6, %s989_s8 }
  0x5a   : > { %p986_p11 = pnand %p984_p9, %p970_p12  ;;  %p992_p4 = scmp.lt.s32.totalorder %s990_s10, %s983_s15 }
  0x5c   : > { %p987_p0 = pneg %p986_p11  ;;  %p993_p13 = por %p992_p4, %p991_p7 }
  0x5e   : > { %p994_p6 = pnand %p993_p13, %p987_p0 }
  0x60   : > { %997 = shalt.err (!%p994_p6)
}
  0x61   : > { %842 = dma.hbm_to_vmem [thread:$0]  (!%p1276_p2), %s1272_s25, 128, %s1280_s6, %s247_s11  }
  0x62   : > { %266 = sbr.rel (%p1179_p8) target bundleno = 616 (0x268), region = 40  ;;  %s1310_s13 = sand.u32 (!%p1179_p8), 1, %s1068_s19  }
  0x63   : > { %s712_s16 = sshll.u32 (!%p1179_p8), %s1310_s13, 3  ;;  %s269_s24 = scalar_lea.sflag (!%p1179_p8), [#allocation4], %s1310_s13 }
  0x64   : > { %s1316_s7 = scalar_lea.vmem (!%p1179_p8), [#allocation3], %s712_s16  ;;  %p1406_p7 = scmp.ne.s32.totalorder (!%p1179_p8), %s1400_s28, 0 }
  0x69   : > { %1051 = dma.done.wait (%p1406_p7), %s269_s24, 128  }
  0x6a   : > { %1053 = vsyncadd (%p1406_p7), %s269_s24, 4294967168  ;;  %p1407_p2 = scmp.ne.s32.totalorder %s1398_s26, 0 }
  0x6c   : > { %1055 = dma.done.wait (%p1407_p2), [#allocation7], 8192  }
  0x6d   : > { %1057 = vsyncadd (%p1407_p2), [#allocation7], 4294959104  ;;  %v1093_v0 = vmov 0.0   ;;  %v325_v1 = vld [vmem:[#allocation6 + $0x8] sm:$0xff]  ;;  %v327_v2 = vld [vmem:[#allocation6 + $0x18] sm:$0xff]  ;;  %s718_s6 = sshll.u32 %s1076_s21, 7 }
  0x6e   : > { %432 = vmatprep.mubr.f32.mxu0 %v1093_v0  ;;  %v324_v3 = vld [vmem:[#allocation6] sm:$0xff]  ;;  %v756_v4 = vpack.c.bf16 %v327_v2, %v325_v1  ;;  %v326_v5 = vld [vmem:[#allocation6 + $0x10] sm:$0xff]  ;;  %v329_v6 = vld [vmem:[#allocation6 + $0x28] sm:$0xff]  ;;  %s310_s9 = scalar_lea.vmem [#allocation9], %s712_s16  ;;  %s1339_s8 = scalar_lea.hbm %s1393_s5, %s718_s6 }
  0x6f   : > { %v331_v7 = vld [vmem:[#allocation6 + $0x38] sm:$0xff]  ;;  %v758_v8 = vpack.c.bf16 %v326_v5, %v324_v3  ;;  %v328_v10 = vld [vmem:[#allocation6 + $0x20] sm:$0xff]  ;;  %v330_v11 = vld [vmem:[#allocation6 + $0x30] sm:$0xff]  ;;  %s589_s11 = sshll.u32 %s310_s9, 4  ;;  %s576_s10 = scalar_lea.sflag [#allocation5], %s1310_s13  ;;  %s1341_s11 = int_to_ptr.vmem [resolvable:$true] %s589_s11 }
  0x70   : > { %v760_v9 = vpack.c.bf16 %v331_v7, %v329_v6  ;;  %v333_v12 = vld [vmem:[#allocation6 + $0x48] sm:$0xff]  ;;  %757 = vmatprep.subr.bf16.mxu0 %v756_v4  ;;  %v335_v13 = vld [vmem:[#allocation6 + $0x58] sm:$0xff]  ;;  %v762_v14 = vpack.c.bf16 %v330_v11, %v328_v10  ;;  %v332_v16 = vld [vmem:[#allocation6 + $0x40] sm:$0xff]  ;;  %s998_s24 = scalar_lea.vmem %s1341_s11, 128  ;;  %p1408_p12 = scmp.ne.s32.totalorder %s1404_s14, 0 }
  0x71   : > { %759 = vmatpush1.bf16.msra.mxu0 %v758_v8  ;;  %v764_v15 = vpack.c.bf16 %v335_v13, %v333_v12  ;;  %v334_v17 = vld [vmem:[#allocation6 + $0x50] sm:$0xff]  ;;  %v337_v18 = vld [vmem:[#allocation6 + $0x68] sm:$0xff]  ;;  %v339_v19 = vld [vmem:[#allocation6 + $0x78] sm:$0xff]  ;;  %p999_p8 = scmp.ne.s32.totalorder %s1341_s11, %s998_s24  ;;  %s1094_s21 = smov [#allocation9]  }
  0x72   : > { %761 = vmatprep.subr.bf16.mxu0 %v760_v9  ;;  %v766_v20 = vpack.c.bf16 %v334_v17, %v332_v16  ;;  %v768_v21 = vpack.c.bf16 %v339_v19, %v337_v18  ;;  %v336_v22 = vld [vmem:[#allocation6 + $0x60] sm:$0xff]  ;;  %v338_v23 = vld [vmem:[#allocation6 + $0x70] sm:$0xff]  ;;  %v341_v24 = vld [vmem:[#allocation6 + $0x88] sm:$0xff]  ;;  %s1002_s16 = sshll.u32 %s1094_s21, 4  ;;  %s1003_s16 = int_to_ptr.vmem [resolvable:$false] %s1002_s16 }
  0x73   : > { %v343_v25 = vld [vmem:[#allocation6 + $0x98] sm:$0xff]  ;;  %v474_v26 = vld [vmem:[#allocation8 + $0x80] sm:$0xff]  ;;  %v475_v27 = vld [vmem:[#allocation8 + $0x88] sm:$0xff]  ;;  %v770_v29 = vpack.c.bf16 %v338_v23, %v336_v22  ;;  %p1000_p1 = pnand %p999_p8, %p1408_p12  ;;  %p1005_p3 = scmp.lt.s32.totalorder %s1341_s11, %s1003_s16 }
  0x74   : > { %v458_v28 = vld [vmem:[#allocation8] sm:$0xff]  ;;  %v788_v30 = vpack.c.bf16 %v475_v27, %v474_v26  ;;  %v459_v31 = vld [vmem:[#allocation8 + $0x8] sm:$0xff]  ;;  %v772_v32 = vpack.c.bf16 %v343_v25, %v341_v24  ;;  %v342_v34 = vld [vmem:[#allocation6 + $0x90] sm:$0xff] }
  0x75   : > { %763 = vmatpush1.bf16.msra.mxu0 %v762_v14  ;;  %v340_v33 = vld [vmem:[#allocation6 + $0x80] sm:$0xff]  ;;  %v790_v35 = vpack.c.bf16 %v459_v31, %v458_v28  ;;  %v345_v36 = vld [vmem:[#allocation6 + $0xa8] sm:$0xff]  ;;  %v347_v37 = vld [vmem:[#allocation6 + $0xb8] sm:$0xff]  ;;  %p1001_p10 = pneg %p1000_p1 }
  0x76   : > { %765 = vmatprep.subr.bf16.mxu0 %v764_v15  ;;  %789 = vmatprep.subr.bf16.mxu1 %v788_v30  ;;  %v774_v38 = vpack.c.bf16 %v342_v34, %v340_v33  ;;  %v776_v39 = vpack.c.bf16 %v347_v37, %v345_v36  ;;  %v344_v40 = vld [vmem:[#allocation6 + $0xa0] sm:$0xff]  ;;  %v346_v41 = vld [vmem:[#allocation6 + $0xb0] sm:$0xff]  ;;  %v349_v42 = vld [vmem:[#allocation6 + $0xc8] sm:$0xff]  ;;  %v358_v34 = vlaneseq }
  0x77   : > { %791 = vmatpush3.bf16.msra.mxu1 %v790_v35  ;;  %v351_v43 = vld [vmem:[#allocation6 + $0xd8] sm:$0xff]  ;;  %v778_v44 = vpack.c.bf16 %v346_v41, %v344_v40  ;;  %v348_v46 = vld [vmem:[#allocation6 + $0xc0] sm:$0xff]  ;;  %v350_v47 = vld [vmem:[#allocation6 + $0xd0] sm:$0xff] }
  0x78   : > { %v780_v45 = vpack.c.bf16 %v351_v43, %v349_v42  ;;  %v353_v48 = vld [vmem:[#allocation6 + $0xe8] sm:$0xff]  ;;  %v355_v49 = vld [vmem:[#allocation6 + $0xf8] sm:$0xff]  ;;  %v782_v50 = vpack.c.bf16 %v350_v47, %v348_v46  ;;  %v352_v52 = vld [vmem:[#allocation6 + $0xe0] sm:$0xff]  ;;  %v359_v35 = vshrl.u32 %v358_v34, 7 }
  0x79   : > { %767 = vmatpush1.bf16.msra.mxu0 %v766_v20  ;;  %v784_v51 = vpack.c.bf16 %v355_v49, %v353_v48  ;;  %v354_v53 = vld [vmem:[#allocation6 + $0xf0] sm:$0xff]  ;;  %v477_v57 = vld [vmem:[#allocation8 + $0x98] sm:$0xff]  ;;  %v478_v62 = vld [vmem:[#allocation8 + $0xa0] sm:$0xff] }
  0x7a   : > { %769 = vmatprep.subr.bf16.mxu0 %v768_v21  ;;  %v786_v54 = vpack.c.bf16 %v354_v53, %v352_v52  ;;  %v323_v55 = vld [vmem:[%s1316_s7] sm:$0xff]  ;;  %v479_v63 = vld [vmem:[#allocation8 + $0xa8] sm:$0xff]  ;;  %v462_v1 = vld [vmem:[#allocation8 + $0x20] sm:$0xff]  ;;  %v360_v36 = vsub.s32 0, %v359_v35  ;;  %s1004_s7 = scalar_lea.vmem %s1003_s16, 256 }
  0x7b   : > { %v476_v56 = vld [vmem:[#allocation8 + $0x90] sm:$0xff]  ;;  %v461_v60 = vld [vmem:[#allocation8 + $0x18] sm:$0xff]  ;;  %v796_v0 = vpack.c.bf16 %v479_v63, %v478_v62  ;;  %v463_v2 = vld [vmem:[#allocation8 + $0x28] sm:$0xff]  ;;  %p1006_p5 = scmp.lt.s32.totalorder %s1004_s7, %s998_s24 }
  0x7c   : > { %v792_v58 = vpack.c.bf16 %v477_v57, %v476_v56  ;;  %v460_v59 = vld [vmem:[#allocation8 + $0x10] sm:$0xff]  ;;  %v798_v3 = vpack.c.bf16 %v463_v2, %v462_v1  ;;  %v481_v5 = vld [vmem:[#allocation8 + $0xb8] sm:$0xff]  ;;  %v482_v10 = vld [vmem:[#allocation8 + $0xc0] sm:$0xff] }
  0x7d   : > { %771 = vmatpush1.bf16.msra.mxu0 %v770_v29  ;;  %v794_v61 = vpack.c.bf16 %v461_v60, %v460_v59  ;;  %v480_v4 = vld [vmem:[#allocation8 + $0xb0] sm:$0xff]  ;;  %v465_v8 = vld [vmem:[#allocation8 + $0x38] sm:$0xff]  ;;  %v483_v11 = vld [vmem:[#allocation8 + $0xc8] sm:$0xff]  ;;  %p1007_p9 = por %p1006_p5, %p1005_p3 }
  0x7e   : > { %773 = vmatprep.subr.bf16.mxu0 %v772_v32  ;;  %793 = vmatprep.subr.bf16.mxu1 %v792_v58  ;;  %v800_v6 = vpack.c.bf16 %v481_v5, %v480_v4  ;;  %v464_v7 = vld [vmem:[#allocation8 + $0x30] sm:$0xff]  ;;  %v466_v12 = vld [vmem:[#allocation8 + $0x40] sm:$0xff]  ;;  %v804_v13 = vpack.c.bf16 %v483_v11, %v482_v10  ;;  %v467_v14 = vld [vmem:[#allocation8 + $0x48] sm:$0xff] }
  0x7f   : > { %795 = vmatpush3.bf16.msra.mxu1 %v794_v61  ;;  %v802_v9 = vpack.c.bf16 %v465_v8, %v464_v7  ;;  %v484_v15 = vld [vmem:[#allocation8 + $0xd0] sm:$0xff]  ;;  %v485_v16 = vld [vmem:[#allocation8 + $0xd8] sm:$0xff]  ;;  %v806_v17 = vpack.c.bf16 %v467_v14, %v466_v12  ;;  %v486_v21 = vld [vmem:[#allocation8 + $0xe0] sm:$0xff]  ;;  %p1008_p11 = pnand %p1007_p9, %p1001_p10 }
  0x80   : > { %797 = vmatprep.subr.bf16.mxu1 %v796_v0  ;;  %v808_v18 = vpack.c.bf16 %v485_v16, %v484_v15  ;;  %v468_v19 = vld [vmem:[#allocation8 + $0x50] sm:$0xff]  ;;  %v469_v20 = vld [vmem:[#allocation8 + $0x58] sm:$0xff]  ;;  %v487_v22 = vld [vmem:[#allocation8 + $0xe8] sm:$0xff] }
  0x81   : > { %775 = vmatpush1.bf16.msra.mxu0 %v774_v38  ;;  %v810_v23 = vpack.c.bf16 %v469_v20, %v468_v19  ;;  %v812_v24 = vpack.c.bf16 %v487_v22, %v486_v21  ;;  %v470_v25 = vld [vmem:[#allocation8 + $0x60] sm:$0xff]  ;;  %v471_v26 = vld [vmem:[#allocation8 + $0x68] sm:$0xff]  ;;  %v488_v27 = vld [vmem:[#allocation8 + $0xf0] sm:$0xff]  ;;  %v364_v38 = vsub.s32 1, %v359_v35 }
  0x82   : > { %777 = vmatprep.subr.bf16.mxu0 %v776_v39  ;;  %v489_v28 = vld [vmem:[#allocation8 + $0xf8] sm:$0xff]  ;;  %v814_v29 = vpack.c.bf16 %v471_v26, %v470_v25  ;;  %v472_v31 = vld [vmem:[#allocation8 + $0x70] sm:$0xff] }
  0x83   : > { %799 = vmatpush3.bf16.msra.mxu1 %v798_v3  ;;  %v816_v30 = vpack.c.bf16 %v489_v28, %v488_v27  ;;  %v473_v32 = vld [vmem:[#allocation8 + $0x78] sm:$0xff]  ;;  %v356_v37 = vld [vmem:[%s1390_s2] sm:$0x3] }
  0x84   : > { %801 = vmatprep.subr.bf16.mxu1 %v800_v6  ;;  %v818_v33 = vpack.c.bf16 %v473_v32, %v472_v31  ;;  %v361_v39 = vrot.slane %v356_v37, %v360_v36  ;;  %v365_v40 = vrot.slane %v356_v37, %v364_v38  ;;  %v716_v1 = vld [vmem:[%s1392_s4] ss:$0 sm:$0xff] }
  0x85   : > { %779 = vmatpush1.bf16.msra.mxu0 %v778_v44 }
  0x86   : > { %781 = vmatprep.subr.bf16.mxu0 %v780_v45 }
  0x87   : > { %803 = vmatpush3.bf16.msra.mxu1 %v802_v9 }
  0x88   : > { %805 = vmatprep.subr.bf16.mxu1 %v804_v13 }
  0x89   : > { %783 = vmatpush1.bf16.msra.mxu0 %v782_v50 }
  0x8a   : > { %785 = vmatprep.subr.bf16.mxu0 %v784_v51 }
  0x8b   : > { %807 = vmatpush3.bf16.msra.mxu1 %v806_v17 }
  0x8c   : > { %809 = vmatprep.subr.bf16.mxu1 %v808_v18 }
  0x8d   : > { %787 = vmatpush1.bf16.msra.mxu0 %v786_v54 }
  0x8f   : > { %811 = vmatpush3.bf16.msra.mxu1 %v810_v23 }
  0x90   : > { %433 = vmatmul.mubr.f32.vlgmr.msra.gmra.mrb[0].mxu0 %v323_v55  ;;  %813 = vmatprep.subr.bf16.mxu1 %v812_v24 }
  0x93   : > { %815 = vmatpush3.bf16.msra.mxu1 %v814_v29 }
  0x94   : > { %817 = vmatprep.subr.bf16.mxu1 %v816_v30 }
  0x97   : > { %819 = vmatpush3.bf16.msra.mxu1 %v818_v33 }
 0x163   : > { %v434_v41 = vpop.f32.mrb[0].mxu0 }
 0x164   : > { %v435_v42 = vadd.f32 %v434_v41, %v361_v39  ;;  %v436_v43 = vpop.f32.mrb[1].mxu0 }
 0x165   : > { %v437_v44 = vadd.f32 %v436_v43, %v365_v40 }
 0x166   : > { %v441_v45 = vmul.f32 %v435_v42, %v435_v42  ;;  %v439_v60 = vmul.f32 0.5, %v435_v42 }
 0x167   : > { %v442_v46 = vmul.f32 %v437_v44, %v437_v44  ;;  %v440_v58 = vmul.f32 0.5, %v437_v44 }
 0x168   : > { %v443_v47 = vmul.f32 %v441_v45, %v435_v42 }
 0x169   : > { %v444_v48 = vmul.f32 %v442_v46, %v437_v44 }
 0x16a   : > { %v445_v49 = vmul.f32 0.044715, %v443_v47 }
 0x16b   : > { %v446_v50 = vmul.f32 0.044715, %v444_v48 }
 0x16c   : > { %v447_v51 = vadd.f32 %v445_v49, %v435_v42 }
 0x16d   : > { %v448_v52 = vadd.f32 %v446_v50, %v437_v44 }
 0x16e   : > { %v449_v53 = vmul.f32 0.7978846, %v447_v51 }
 0x16f   : > { %v450_v54 = vmul.f32 0.7978846, %v448_v52 }
 0x170   : > { %908 = vtanh.f32 %v449_v53 }
 0x171   : > { %910 = vtanh.f32 %v450_v54 }
 0x17a   : > { %v909_v55 = vpop.eup %908 }
 0x17b   : > { %v911_v56 = vpop.eup %910  ;;  %v453_v57 = vadd.f32 1.0, %v909_v55 }
 0x17c   : > { %v454_v59 = vadd.f32 1.0, %v911_v56 }
 0x17d   : > { %v455_v62 = vmul.f32 %v453_v57, %v439_v60 }
 0x17e   : > { %v456_v61 = vmul.f32 %v454_v59, %v440_v58 }
 0x180   : > { %554 = vmatprep.mubr.f32.mxu1 %v456_v61 }
 0x181   : > { %555 = vmatmul.mubr.f32.vlgmr.msra.gmra.mrb[0].mxu1 %v455_v62 }
 0x254   : > { %v753_v63 = vpop.f32.mrb[0].mxu1 }
 0x255   : > { %v754_v0 = vpop.f32.mrb[1].mxu1 }
 0x256   : > { %v755_v2 = vadd.f32 %v754_v0, %v753_v63 }
 0x258   : > { %v573_v3 = vadd.f32 %v755_v2, %v716_v1 }
 0x25a   : > { %574 = vst [vmem:[%s310_s9] sm:$0xff] %v573_v3 }
 0x25b   : > { %1011 = shalt.err (!%p1008_p11)
}
 0x25c   : > { %s1012_s13 = scalar_lea.hbm %s1339_s8, 128  ;;  %s1016_s30 = scalar_lea.hbm %s1393_s5, 256 }
 0x25d   : > { %p1013_p0 = scmp.ne.s32.totalorder %s1339_s8, %s1012_s13  ;;  %p1017_p6 = scmp.lt.u32.totalorder %s1339_s8, %s1393_s5 }
 0x25e   : > { %p1018_p7 = scmp.lt.u32.totalorder %s1016_s30, %s1012_s13  ;;  %p1020_p8 = scmp.lt.u32.totalorder %s1012_s13, %s1339_s8 }
 0x25f   : > { %p1014_p4 = pnand %p1013_p0, %p1408_p12 }
 0x260   : > { %p1019_p2 = por %p1018_p7, %p1017_p6 }
 0x261   : > { %p1015_p13 = pneg %p1014_p4 }
 0x262   : > { %p1021_p1 = por %p1020_p8, %p1019_p2 }
 0x264   : > { %p1022_p10 = pnand %p1021_p1, %p1015_p13 }
 0x266   : > { %1025 = shalt.err (!%p1022_p10)
}
 0x267   : > { %830 = dma.vmem_to_hbm [thread:$0]  (%p1408_p12), %s1341_s11, 128, %s1339_s8, %s576_s10  }
 0x268 PF: > { %s601_s9 = sand.u32 1, %s1064_s18   ;;  %p1409_p3 = scmp.ne.s32.totalorder %s1401_s29, 0 }
 0x269   : > { %p1410_p5 = scmp.ge.s32.totalorder %s1084_s23, 2  ;;  %s602_s15 = scalar_lea.sflag [#allocation5], %s601_s9 }
 0x26b   : > { %p844_p9 = pnand %p1410_p5, %p1409_p3 }
 0x26d   : > { %1059 = dma.done.wait (!%p844_p9), %s602_s15, 128  }
 0x26e   : > { %1061 = vsyncadd (!%p844_p9), %s602_s15, 4294967168  ;;  %s22_s23 = sadd.s32 1, %s1084_s23   ;;  %s1411_s18 = smov %s1068_s19 }
 0x26f   : > { %p19_p11 = scmp.ge.s32.totalorder %s22_s23, 4   ;;  %s1412_s19 = smov %s1072_s20 }
 0x270   : > { %s1413_s20 = smov %s1267_s17  ;;  %s1414_s21 = smov %s1080_s22 }
 0x271   : > { %s1415_s22 = smov %s1417_s12  ;;  %21 = sbr.rel (!%p19_p11) target bundleno = 7 (0x7), region = 106 }
 0x278   :  { %607 = vsyncpa [#allocation4], 1 }
 0x279   :  { %609 = vsyncpa [#allocation4 + $0x1], 1 }
 0x27a   :  { %610 = vsyncpa [#allocation7], 1 }
 0x27b   :  { %611 = vsyncpa [#allocation5], 1 }
 0x27c   :  { %613 = vsyncpa [#allocation5 + $0x1], 1 }

</bundles_post_ra>
